<compile_context>
chip_gen: v5e
topology: v5e:2x2
jax: 0.10.0
libtpu: 0.0.40
codegen_flags: <defaults>
</compile_context>

<pallas_src>
import functools

import jax
import jax.numpy as jnp
from jax.experimental import pallas as pl
from jax.experimental.pallas import tpu as pltpu

LANES = 128               # lane width of one packed layer block
PARAM_ROWS = 4 * LANES    # 4 layer blocks stacked -> (512, 128) slab
BIAS_ROW = LANES - 1      # row of each block that holds the bias
_NOGRID_MAX_ROWS = 4096   # largest batch handled by the no-grid whole-array path
_MAX_BLOCK_B = 4096       # VMEM-safe batch-tile cap for the gridded path

_VMEM = pl.BlockSpec(memory_space=pltpu.MemorySpace.VMEM)


# ----------------------------------------------------------------------------- kernels

def _mlp_q(x_ref, p_ref, state_size):
    """Shared MLP body: returns the 128-lane-wide Q tile (valid lanes = [:action_size]).

    Packed slab layout, block l = p_ref[l*128:(l+1)*128]:
      [:fan_in, :fan_out] = W_l        (y = x @ W_l)
      [127,     :fan_out] = b_l        (explicit broadcast add below)
      everything else     = 0.0        (so dead lanes stay exactly zero through ReLU)
    Lane 127 of every activation is exactly 0, so the bias rows never leak into the
    following matmul.
    """
    f32 = jnp.float32
    x = x_ref[...].astype(f32)                                       # (B, F) natural width

    def w(l):
        return p_ref[l * LANES:(l + 1) * LANES, :]                   # (128, 128)

    def b(l):
        r = l * LANES + BIAS_ROW
        return p_ref[r:r + 1, :]                                     # (1, 128) bias row

    # Layer 1 uses only the first `state_size` rows of block 0 (x stays natural width).
    h = jnp.dot(x, p_ref[0:state_size, :], preferred_element_type=f32)
    h = jnp.maximum(h + b(0), 0.0)
    h = jnp.maximum(jnp.dot(h, w(1), preferred_element_type=f32) + b(1), 0.0)
    h = jnp.maximum(jnp.dot(h, w(2), preferred_element_type=f32) + b(2), 0.0)
    return jnp.dot(h, w(3), preferred_element_type=f32) + b(3)       # (B, 128)


def dqn_mlp_kernel(x_ref, p_ref, out_ref, *, state_size, action_size):
    """Fused 4-layer MLP: x (B, state_size) -> Q (B, action_size)."""
    q = _mlp_q(x_ref, p_ref, state_size)
    out_ref[...] = q[:, :action_size].astype(out_ref.dtype)


def dqn_argmax_kernel(x_ref, p_ref, act_ref, *, state_size, action_size):
    """Same MLP, fused greedy action: argmax_a Q(s, a) as int32 (env-step path)."""
    q = _mlp_q(x_ref, p_ref, state_size)
    lane = jax.lax.broadcasted_iota(jnp.int32, q.shape, 1)
    qm = jnp.where(lane < action_size, q, -jnp.inf)
    best = jnp.max(qm, axis=-1, keepdims=True)
    act = jnp.min(jnp.where(qm >= best, lane, LANES), axis=-1, keepdims=True)
    act_ref[...] = act.astype(act_ref.dtype)


# ----------------------------------------------------------------------------- params

def init_params(key, state_size, action_size=2, hidden=32):
    """Deterministic init mimicking nn.Linear's U(-1/sqrt(fan_in), 1/sqrt(fan_in))."""
    dims = [(state_size, hidden), (hidden, hidden), (hidden, hidden), (hidden, action_size)]
    params = {}
    for idx, (fan_in, fan_out) in enumerate(dims, start=1):
        key, kw, kb = jax.random.split(key, 3)
        bound = 1.0 / jnp.sqrt(jnp.float32(fan_in))
        params[f"w{idx}"] = jax.random.uniform(
            kw, (fan_in, fan_out), jnp.float32, minval=-bound, maxval=bound)
        params[f"b{idx}"] = jax.random.uniform(
            kb, (fan_out,), jnp.float32, minval=-bound, maxval=bound)
    return params


def pack_params(params):
    """Pack the 4 (W, b) pairs into one (512, 128) f32 slab (single weight DMA)."""
    blocks = []
    for idx in range(1, 5):
        w = jnp.asarray(params[f"w{idx}"], jnp.float32)
        b = jnp.asarray(params[f"b{idx}"], jnp.float32).reshape(-1)
        fan_in, fan_out = w.shape
        assert fan_in <= BIAS_ROW, (
            f"layer {idx}: fan_in={fan_in} would collide with bias row {BIAS_ROW}")
        assert fan_out <= LANES, f"layer {idx}: fan_out={fan_out} > {LANES}"
        blk = jnp.zeros((LANES, LANES), jnp.float32)
        blk = blk.at[:fan_in, :fan_out].set(w)
        blk = blk.at[BIAS_ROW, :fan_out].set(b)
        blocks.append(blk)
    return jnp.concatenate(blocks, axis=0)   # (512, 128)


# ----------------------------------------------------------------------------- wrappers

def _dqn_forward_nogrid(x, packed_params, action_size):
    """No-grid path: whole arrays resident in VMEM, zero pipeline overhead."""
    B, F = x.shape
    kernel = functools.partial(dqn_mlp_kernel, state_size=F, action_size=action_size)
    return pl.pallas_call(
        kernel,
        out_shape=jax.ShapeDtypeStruct((B, action_size), jnp.float32),
        in_specs=[_VMEM, _VMEM],
        out_specs=_VMEM,
    )(x, packed_params)


def _dqn_forward_grid(x, packed_params, action_size, block_b):
    """Batch-tiled path for very large replay batches.

    States/Q-values are DMA'd at natural width, rows are NOT padded to a block
    multiple (grid = cdiv), and the weight slab stays VMEM-resident via a constant
    index_map.  2-TC sharding is only requested when there are >= 2 grid steps.
    """
    B, F = x.shape
    block_b = max(8, (min(int(block_b), _MAX_BLOCK_B) // 8) * 8)   # sublane-aligned, VMEM-safe
    grid_n = pl.cdiv(B, block_b)
    sem = "parallel" if grid_n >= 2 else "arbitrary"
    kernel = functools.partial(dqn_mlp_kernel, state_size=F, action_size=action_size)
    return pl.pallas_call(
        kernel,
        out_shape=jax.ShapeDtypeStruct((B, action_size), jnp.float32),
        grid=(grid_n,),
        in_specs=[
            pl.BlockSpec((block_b, F), lambda i: (i, 0)),              # states, natural width
            pl.BlockSpec((PARAM_ROWS, LANES), lambda i: (0, 0)),       # weights VMEM-resident
        ],
        out_specs=pl.BlockSpec((block_b, action_size), lambda i: (i, 0)),
        compiler_params=pltpu.CompilerParams(dimension_semantics=(sem,)),
    )(x, packed_params)


@functools.partial(jax.jit, static_argnames=("action_size", "block_b"))
def dqn_forward(x, packed_params, *, action_size=2, block_b=2048):
    """Q(s, .) for a batch of states: x (B, state_size) -> (B, action_size)."""
    x = x.astype(jnp.float32)
    if x.shape[0] <= _NOGRID_MAX_ROWS:
        return _dqn_forward_nogrid(x, packed_params, action_size)
    return _dqn_forward_grid(x, packed_params, action_size, block_b)


@functools.partial(jax.jit, static_argnames=("action_size",))
def dqn_select_action(x, packed_params, *, action_size=2):
    """Greedy action argmax_a Q(s, a), fused into the forward kernel (env-step path)."""
    x = x.astype(jnp.float32)
    B, F = x.shape
    kernel = functools.partial(dqn_argmax_kernel, state_size=F, action_size=action_size)
    act = pl.pallas_call(
        kernel,
        out_shape=jax.ShapeDtypeStruct((B, 1), jnp.int32),
        in_specs=[_VMEM, _VMEM],
        out_specs=_VMEM,
    )(x, packed_params)
    return act[:, 0]


def dqn_forward_ref(x, params):
    h = jnp.maximum(x @ params["w1"] + params["b1"], 0.0)
    h = jnp.maximum(h @ params["w2"] + params["b2"], 0.0)
    h = jnp.maximum(h @ params["w3"] + params["b3"], 0.0)
    return h @ params["w4"] + params["b4"]


# ----------------------------------------------------------------------------- demo

if __name__ == "__main__":
    state_size = 4    # CartPole-v1 observation dim
    action_size = 2   # CartPole-v1 action dim

    key = jax.random.PRNGKey(0)
    key, kx, kb = jax.random.split(key, 3)
    params = init_params(key, state_size, action_size)
    packed = pack_params(params)                     # host-side, once

    # --- small (env-step / minibatch) path: single fused pallas_call, no pad/slice HLOs
    x = jax.random.normal(kx, (8, state_size), jnp.float32)
    q = jax.block_until_ready(dqn_forward(x, packed, action_size=action_size))
    q_ref = dqn_forward_ref(x, params)
    assert q.shape == (8, action_size)
    assert jnp.allclose(q, q_ref, atol=1e-5, rtol=1e-5), "no-grid path mismatch vs reference"

    # single-state env step + fused greedy-action epilogue
    x1 = x[:1]
    q1 = jax.block_until_ready(dqn_forward(x1, packed, action_size=action_size))
    assert jnp.allclose(q1, q_ref[:1], atol=1e-5, rtol=1e-5), "B=1 mismatch vs reference"
    a1 = jax.block_until_ready(dqn_select_action(x1, packed, action_size=action_size))
    assert a1.shape == (1,)
    assert int(a1[0]) == int(jnp.argmax(q_ref[0])), "fused argmax mismatch"

    # --- gridded path exercised directly: batch NOT a multiple of block_b (grid = cdiv,
    #     no row padding), weights VMEM-resident, states/Q at natural width.
    xb = jax.random.normal(kb, (200, state_size), jnp.float32)
    qb = jax.block_until_ready(
        jax.jit(_dqn_forward_grid, static_argnums=(2, 3))(xb, packed, action_size, 64))
    qb_ref = dqn_forward_ref(xb, params)
    assert qb.shape == (200, action_size)
    assert jnp.allclose(qb, qb_ref, atol=1e-5, rtol=1e-5), "gridded path mismatch vs reference"

    print("KERNEL_OK")
</pallas_src>

<mosaic_0001>
module attributes {stable_mosaic.version = 11 : i64} {
  func.func @dqn_mlp_kernel(%arg0: memref<8x4xf32, #tpu.memory_space<vmem>>, %arg1: memref<512x128xf32, #tpu.memory_space<vmem>>, %arg2: memref<8x2xf32, #tpu.memory_space<vmem>>) attributes {dimension_semantics = [], scalar_prefetch = 0 : i64, scratch_operands = 0 : i64, tpu.core_type = #tpu.core_type<tc>} {
    %c0 = arith.constant 0 : index
    %c0_0 = arith.constant 0 : index
    %0 = vector.load %arg0[%c0, %c0_0] : memref<8x4xf32, #tpu.memory_space<vmem>>, vector<8x4xf32>
    %c0_1 = arith.constant 0 : index
    %c0_2 = arith.constant 0 : index
    %1 = vector.load %arg1[%c0_1, %c0_2] : memref<512x128xf32, #tpu.memory_space<vmem>>, vector<4x128xf32>
    %cst = arith.constant dense<0.000000e+00> : vector<8x128xf32>
    %2 = tpu.matmul %0, %1, %cst {dimension_numbers = #tpu.dot_dimension_numbers<[1], [0], [0], [1], [0, 0, 1, 1], [], []>} : vector<8x4xf32>, vector<4x128xf32>, vector<8x128xf32> -> vector<8x128xf32>
    %c127 = arith.constant 127 : index
    %c0_3 = arith.constant 0 : index
    %3 = vector.load %arg1[%c127, %c0_3] : memref<512x128xf32, #tpu.memory_space<vmem>>, vector<1x128xf32>
    %4 = vector.broadcast %3 : vector<1x128xf32> to vector<8x128xf32>
    %5 = arith.addf %2, %4 : vector<8x128xf32>
    %cst_4 = arith.constant 0.000000e+00 : f32
    %6 = vector.broadcast %cst_4 : f32 to vector<8x128xf32>
    %7 = arith.maximumf %5, %6 : vector<8x128xf32>
    %c128 = arith.constant 128 : index
    %c0_5 = arith.constant 0 : index
    %8 = vector.load %arg1[%c128, %c0_5] : memref<512x128xf32, #tpu.memory_space<vmem>>, vector<128x128xf32>
    %cst_6 = arith.constant dense<0.000000e+00> : vector<8x128xf32>
    %9 = tpu.matmul %7, %8, %cst_6 {dimension_numbers = #tpu.dot_dimension_numbers<[1], [0], [0], [1], [0, 0, 1, 1], [], []>} : vector<8x128xf32>, vector<128x128xf32>, vector<8x128xf32> -> vector<8x128xf32>
    %c255 = arith.constant 255 : index
    %c0_7 = arith.constant 0 : index
    %10 = vector.load %arg1[%c255, %c0_7] : memref<512x128xf32, #tpu.memory_space<vmem>>, vector<1x128xf32>
    %11 = vector.broadcast %10 : vector<1x128xf32> to vector<8x128xf32>
    %12 = arith.addf %9, %11 : vector<8x128xf32>
    %cst_8 = arith.constant 0.000000e+00 : f32
    %13 = vector.broadcast %cst_8 : f32 to vector<8x128xf32>
    %14 = arith.maximumf %12, %13 : vector<8x128xf32>
    %c256 = arith.constant 256 : index
    %c0_9 = arith.constant 0 : index
    %15 = vector.load %arg1[%c256, %c0_9] : memref<512x128xf32, #tpu.memory_space<vmem>>, vector<128x128xf32>
    %cst_10 = arith.constant dense<0.000000e+00> : vector<8x128xf32>
    %16 = tpu.matmul %14, %15, %cst_10 {dimension_numbers = #tpu.dot_dimension_numbers<[1], [0], [0], [1], [0, 0, 1, 1], [], []>} : vector<8x128xf32>, vector<128x128xf32>, vector<8x128xf32> -> vector<8x128xf32>
    %c383 = arith.constant 383 : index
    %c0_11 = arith.constant 0 : index
    %17 = vector.load %arg1[%c383, %c0_11] : memref<512x128xf32, #tpu.memory_space<vmem>>, vector<1x128xf32>
    %18 = vector.broadcast %17 : vector<1x128xf32> to vector<8x128xf32>
    %19 = arith.addf %16, %18 : vector<8x128xf32>
    %cst_12 = arith.constant 0.000000e+00 : f32
    %20 = vector.broadcast %cst_12 : f32 to vector<8x128xf32>
    %21 = arith.maximumf %19, %20 : vector<8x128xf32>
    %c384 = arith.constant 384 : index
    %c0_13 = arith.constant 0 : index
    %22 = vector.load %arg1[%c384, %c0_13] : memref<512x128xf32, #tpu.memory_space<vmem>>, vector<128x128xf32>
    %cst_14 = arith.constant dense<0.000000e+00> : vector<8x128xf32>
    %23 = tpu.matmul %21, %22, %cst_14 {dimension_numbers = #tpu.dot_dimension_numbers<[1], [0], [0], [1], [0, 0, 1, 1], [], []>} : vector<8x128xf32>, vector<128x128xf32>, vector<8x128xf32> -> vector<8x128xf32>
    %c511 = arith.constant 511 : index
    %c0_15 = arith.constant 0 : index
    %24 = vector.load %arg1[%c511, %c0_15] : memref<512x128xf32, #tpu.memory_space<vmem>>, vector<1x128xf32>
    %25 = vector.broadcast %24 : vector<1x128xf32> to vector<8x128xf32>
    %26 = arith.addf %23, %25 : vector<8x128xf32>
    %27 = vector.extract_strided_slice %26 {offsets = [0, 0], sizes = [8, 2], strides = [1, 1]} : vector<8x128xf32> to vector<8x2xf32>
    %c0_16 = arith.constant 0 : index
    %c0_17 = arith.constant 0 : index
    %28 = vector.load %arg2[%c0_16, %c0_17] : memref<8x2xf32, #tpu.memory_space<vmem>>, vector<8x2xf32>
    tpu.vector_store %arg2[%c0_16, %c0_17], %27 {strides = array<i32>} : memref<8x2xf32, #tpu.memory_space<vmem>>, vector<8x2xf32>,
    return
  }
}

</mosaic_0001>

<bundles_post_ra>
// kernel: dqn_forward.1
= control target key start
LH: loop header
LB: loop body
LE: loop exit
PB: predicated region body
PF: predicated region fallthrough
CT: control target
= control target key end

     0   :  { %7 = vsyncpa [#allocation3], 0  ;;  %s218_s12 = smov [#allocation2]   ;;  %s219_s14 = smov 128   ;;  %s245_s0 = inlined_call_operand.vmem [shape: f32[8,4], index: 0, kind: input, shape index: {}]   ;;  %s246_s1 = inlined_call_operand.hbm [shape: f32[512,128], index: 1, kind: input, shape index: {}]   ;;  %s247_s2 = inlined_call_operand.vmem [shape: f32[8,2], index: 2, kind: output, shape index: {}]  }
   0x1   :  { %s14_s11 = sshll.u32 %s246_s1, 4  ;;  %s16_s13 = sshll.u32 %s218_s12, 4  ;;  %s15_s11 = int_to_ptr.hbm [resolvable:$true] %s14_s11  ;;  %s17_s13 = int_to_ptr.vmem [resolvable:$true] %s16_s13 }
   0x2   :  { %s220_s15 = smov 8  }
   0x3   :  { %22 = dma.hbm_to_vmem [thread:$0]  %s15_s11, 8192, %s17_s13, [#allocation3], %s219_s14, %s219_s14, %s220_s15  }
   0x4   :  { %216 = dma.done.wait [#allocation3], 8192  }
   0x5   :  { %217 = vsyncadd [#allocation3], 4294959104  ;;  %vm35_vm0 = vcmask 1043456   ;;  %vm31_vm1 = vcmask 31744   ;;  %v28_v0 = vld [vmem:[#allocation2] sm:$0xf] }
   0x6   :  { %v27_v1 = vld [vmem:[%s245_s0] sm:$0xff]  ;;  %v75_v2 = vld [vmem:[#allocation2 + $0xf8] sm:$0xff]  ;;  %183 = vmatpush.msk.msra.mxu0 %vm35_vm0, %v28_v0  ;;  %v74_v3 = vld [vmem:[#allocation2 + $0xf0] sm:$0xff]  ;;  %vm176_vm2 = vcmask 15360  }
   0x7   :  { %78 = vmatpush.msra.mxu1 %v75_v2  ;;  %184 = vmatmul.msk.f32.vlgmr.msra.gmra.mxu0 %vm31_vm1, %v27_v1  ;;  %v73_v4 = vld [vmem:[#allocation2 + $0xe8] sm:$0xff]  ;;  %v72_v5 = vld [vmem:[#allocation2 + $0xe0] sm:$0xff]  ;;  %v71_v6 = vld [vmem:[#allocation2 + $0xd8] sm:$0xff] }
   0x8   :  { %v70_v7 = vld [vmem:[#allocation2 + $0xd0] sm:$0xff]  ;;  %v69_v8 = vld [vmem:[#allocation2 + $0xc8] sm:$0xff]  ;;  %v68_v9 = vld [vmem:[#allocation2 + $0xc0] sm:$0xff] }
   0x9   :  { %79 = vmatpush.msra.mxu1 %v74_v3  ;;  %v67_v10 = vld [vmem:[#allocation2 + $0xb8] sm:$0xff]  ;;  %v66_v11 = vld [vmem:[#allocation2 + $0xb0] sm:$0xff]  ;;  %v65_v12 = vld [vmem:[#allocation2 + $0xa8] sm:$0xff] }
   0xa   :  { %v64_v13 = vld [vmem:[#allocation2 + $0xa0] sm:$0xff]  ;;  %v63_v14 = vld [vmem:[#allocation2 + $0x98] sm:$0xff]  ;;  %v62_v15 = vld [vmem:[#allocation2 + $0x90] sm:$0xff] }
   0xb   :  { %80 = vmatpush.msra.mxu1 %v73_v4  ;;  %v61_v16 = vld [vmem:[#allocation2 + $0x88] sm:$0xff]  ;;  %v60_v17 = vld [vmem:[#allocation2 + $0x80] sm:$0xff]  ;;  %v114_v18 = vld [vmem:[#allocation2 + $0x178] sm:$0xff] }
   0xc   :  { %v113_v19 = vld [vmem:[#allocation2 + $0x170] sm:$0xff]  ;;  %117 = vmatpush.msra.mxu2 %v114_v18  ;;  %v112_v20 = vld [vmem:[#allocation2 + $0x168] sm:$0xff]  ;;  %v111_v21 = vld [vmem:[#allocation2 + $0x160] sm:$0xff] }
   0xd   :  { %81 = vmatpush.msra.mxu1 %v72_v5  ;;  %v110_v22 = vld [vmem:[#allocation2 + $0x158] sm:$0xff]  ;;  %v109_v23 = vld [vmem:[#allocation2 + $0x150] sm:$0xff]  ;;  %v108_v24 = vld [vmem:[#allocation2 + $0x148] sm:$0xff] }
   0xe   :  { %118 = vmatpush.msra.mxu2 %v113_v19  ;;  %v107_v25 = vld [vmem:[#allocation2 + $0x140] sm:$0xff]  ;;  %v106_v26 = vld [vmem:[#allocation2 + $0x138] sm:$0xff]  ;;  %v105_v27 = vld [vmem:[#allocation2 + $0x130] sm:$0xff] }
   0xf   :  { %82 = vmatpush.msra.mxu1 %v71_v6  ;;  %v104_v28 = vld [vmem:[#allocation2 + $0x128] sm:$0xff]  ;;  %v103_v29 = vld [vmem:[#allocation2 + $0x120] sm:$0xff]  ;;  %v102_v30 = vld [vmem:[#allocation2 + $0x118] sm:$0xff] }
  0x10   :  { %119 = vmatpush.msra.mxu2 %v112_v20  ;;  %v188_v31 = vld [vmem:[#allocation2 + $0x7f] ss:$0 sm:$0xff]  ;;  %v101_v35 = vld [vmem:[#allocation2 + $0x110] sm:$0xff]  ;;  %v100_v36 = vld [vmem:[#allocation2 + $0x108] sm:$0xff] }
  0x11   :  { %83 = vmatpush.msra.mxu1 %v70_v7  ;;  %v99_v37 = vld [vmem:[#allocation2 + $0x100] sm:$0xff]  ;;  %v153_v38 = vld [vmem:[#allocation2 + $0x1f8] sm:$0xff]  ;;  %v152_v39 = vld [vmem:[#allocation2 + $0x1f0] sm:$0xff] }
  0x12   :  { %120 = vmatpush.msra.mxu2 %v111_v21  ;;  %156 = vmatpush.msra.mxu3 %v153_v38  ;;  %v151_v40 = vld [vmem:[#allocation2 + $0x1e8] sm:$0xff]  ;;  %v150_v41 = vld [vmem:[#allocation2 + $0x1e0] sm:$0xff]  ;;  %v149_v42 = vld [vmem:[#allocation2 + $0x1d8] sm:$0xff] }
  0x13   :  { %84 = vmatpush.msra.mxu1 %v69_v8  ;;  %v148_v43 = vld [vmem:[#allocation2 + $0x1d0] sm:$0xff]  ;;  %v147_v44 = vld [vmem:[#allocation2 + $0x1c8] sm:$0xff]  ;;  %v146_v45 = vld [vmem:[#allocation2 + $0x1c0] sm:$0xff] }
  0x14   :  { %121 = vmatpush.msra.mxu2 %v110_v22  ;;  %157 = vmatpush.msra.mxu3 %v152_v39  ;;  %v145_v46 = vld [vmem:[#allocation2 + $0x1b8] sm:$0xff]  ;;  %v144_v47 = vld [vmem:[#allocation2 + $0x1b0] sm:$0xff]  ;;  %v143_v48 = vld [vmem:[#allocation2 + $0x1a8] sm:$0xff] }
  0x15   :  { %85 = vmatpush.msra.mxu1 %v68_v9  ;;  %v142_v49 = vld [vmem:[#allocation2 + $0x1a0] sm:$0xff]  ;;  %v141_v50 = vld [vmem:[#allocation2 + $0x198] sm:$0xff]  ;;  %v140_v55 = vld [vmem:[#allocation2 + $0x190] sm:$0xff] }
  0x16   :  { %122 = vmatpush.msra.mxu2 %v109_v23  ;;  %158 = vmatpush.msra.mxu3 %v151_v40  ;;  %v189_v51 = vld [vmem:[#allocation2 + $0xff] ss:$0 sm:$0xff]  ;;  %v139_v56 = vld [vmem:[#allocation2 + $0x188] sm:$0xff]  ;;  %v138_v57 = vld [vmem:[#allocation2 + $0x180] sm:$0xff] }
  0x17   :  { %86 = vmatpush.msra.mxu1 %v67_v10  ;;  %v190_v58 = vld [vmem:[#allocation2 + $0x17f] ss:$0 sm:$0xff] }
  0x18   :  { %123 = vmatpush.msra.mxu2 %v108_v24  ;;  %159 = vmatpush.msra.mxu3 %v150_v41  ;;  %v191_v62 = vld [vmem:[#allocation2 + $0x1ff] ss:$0 sm:$0xff] }
  0x19   :  { %87 = vmatpush.msra.mxu1 %v66_v11 }
  0x1a   :  { %124 = vmatpush.msra.mxu2 %v107_v25  ;;  %160 = vmatpush.msra.mxu3 %v149_v42 }
  0x1b   :  { %88 = vmatpush.msra.mxu1 %v65_v12 }
  0x1c   :  { %125 = vmatpush.msra.mxu2 %v106_v26  ;;  %161 = vmatpush.msra.mxu3 %v148_v43 }
  0x1d   :  { %89 = vmatpush.msra.mxu1 %v64_v13 }
  0x1e   :  { %126 = vmatpush.msra.mxu2 %v105_v27  ;;  %162 = vmatpush.msra.mxu3 %v147_v44 }
  0x1f   :  { %90 = vmatpush.msra.mxu1 %v63_v14 }
  0x20   :  { %127 = vmatpush.msra.mxu2 %v104_v28  ;;  %163 = vmatpush.msra.mxu3 %v146_v45 }
  0x21   :  { %91 = vmatpush.msra.mxu1 %v62_v15 }
  0x22   :  { %128 = vmatpush.msra.mxu2 %v103_v29  ;;  %164 = vmatpush.msra.mxu3 %v145_v46 }
  0x23   :  { %92 = vmatpush.msra.mxu1 %v61_v16 }
  0x24   :  { %129 = vmatpush.msra.mxu2 %v102_v30  ;;  %165 = vmatpush.msra.mxu3 %v144_v47 }
  0x25   :  { %93 = vmatpush.msra.mxu1 %v60_v17 }
  0x26   :  { %130 = vmatpush.msra.mxu2 %v101_v35  ;;  %166 = vmatpush.msra.mxu3 %v143_v48 }
  0x28   :  { %131 = vmatpush.msra.mxu2 %v100_v36  ;;  %167 = vmatpush.msra.mxu3 %v142_v49 }
  0x2a   :  { %132 = vmatpush.msra.mxu2 %v99_v37  ;;  %168 = vmatpush.msra.mxu3 %v141_v50 }
  0x2c   :  { %169 = vmatpush.msra.mxu3 %v140_v55 }
  0x2e   :  { %170 = vmatpush.msra.mxu3 %v139_v56 }
  0x30   :  { %171 = vmatpush.msra.mxu3 %v138_v57 }
  0x84   :  { %v56_v32 = vpop.f32.mrf.mxu0 }
  0x85   :  { %v57_v33 = vadd.f32 %v188_v31, %v56_v32 }
  0x87   :  { %v59_v34 = vmax.f32 %v57_v33, 0.0 }
  0x89   :  { %94 = vmatmul.f32.vlgmr.msra.gmra.mxu1 %v59_v34 }
 0x106   :  { %v95_v52 = vpop.f32.mrf.mxu1 }
 0x107   :  { %v96_v53 = vadd.f32 %v189_v51, %v95_v52 }
 0x109   :  { %v98_v54 = vmax.f32 %v96_v53, 0.0 }
 0x10b   :  { %133 = vmatmul.f32.vlgmr.msra.gmra.mxu2 %v98_v54 }
 0x18e   :  { %v134_v59 = vpop.f32.mrf.mxu2 }
 0x18f   :  { %v135_v60 = vadd.f32 %v190_v58, %v134_v59 }
 0x191   :  { %v137_v61 = vmax.f32 %v135_v60, 0.0 }
 0x193   :  { %172 = vmatmul.f32.vlgmr.msra.gmra.mxu3 %v137_v61 }
 0x216   :  { %v173_v63 = vpop.f32.mrf.mxu3 }
 0x217   :  { %v174_v0 = vadd.f32 %v191_v62, %v173_v63 }
 0x219   :  { %177 = vst.msk [vmem:[%s247_s2] sm:$0xff] %vm176_vm2, %v174_v0 }
 0x21a   :  { %182 = vsyncpa [#allocation3], 1 }

</bundles_post_ra>
